<compile_context>
chip_gen: v6e
topology: v6e:2x2x1
jax: 0.10.0
libtpu: 0.0.40
codegen_flags: <defaults>
</compile_context>

<pallas_src>
import functools
import math

import jax
import jax.numpy as jnp
from jax.experimental import pallas as pl
from jax.experimental.pallas import tpu as pltpu


# --------------------------- hardware-aware config ---------------------------

def _vmem_capacity_bytes():
    try:
        info = pltpu.get_tpu_info()
        for name in ("vmem_capacity_bytes", "vmem_size_bytes", "vmem_bytes"):
            v = getattr(info, name, None)
            if v:
                return int(v)
    except Exception:
        pass
    return 64 * 1024 * 1024  # conservative (v7x-sized) default


_VMEM_CAP = _vmem_capacity_bytes()
_BIG_VMEM = _VMEM_CAP >= 100 * 1024 * 1024            # v5e / v6e: 128 MiB parts
_VMEM_LIMIT = (100 if _BIG_VMEM else 48) * 1024 * 1024
_VMEM_BUDGET = int(_VMEM_LIMIT * 0.9)                 # headroom for pipeline internals

_MM_TM = 512 if _BIG_VMEM else 256    # matmul row tile
_MM_TN = 256                          # matmul output-column tile
_MM_TK = 1024 if _BIG_VMEM else 512   # matmul contraction tile
_RMS_MM_TN = 512 if _BIG_VMEM else 256  # lm_head / QKV fused-norm column tile
_FFN_TM = 512 if _BIG_VMEM else 256
_FFN_TK = 512 if _BIG_VMEM else 256
_ATTN_TQ = 256
_ATTN_TKV = 512 if _BIG_VMEM else 256


def _round_up(x, m):
    return -(-x // m) * m


def _fit_tile(dim, target, mult):
    """Full-dim tile for small dims, otherwise the aligned target (pad + cdiv)."""
    assert target % mult == 0
    return dim if dim <= target else target


def _halve(t, mult):
    if t <= mult:
        return t
    return max(mult, _round_up(t // 2, mult))


def _pad2d(a, rows, cols):
    r, c = a.shape
    if r == rows and c == cols:
        return a
    return jnp.pad(a, ((0, rows - r), (0, cols - c)))


# ------------------------------ Pallas kernels --------------------------------


def _matmul_kernel(x_ref, w_ref, o_ref, acc_ref):
    @pl.when(pl.program_id(2) == 0)
    def _():
        acc_ref[...] = jnp.zeros(acc_ref.shape, jnp.float32)

    acc_ref[...] += jnp.dot(x_ref[...], w_ref[...],
                            preferred_element_type=jnp.float32)

    @pl.when(pl.program_id(2) == pl.num_programs(2) - 1)
    def _():
        o_ref[...] = acc_ref[...].astype(o_ref.dtype)


def pallas_matmul(x, w):
    """x: (M, K) @ w: (K, N) -> (M, N). bf16 operands, fp32 VMEM accumulator."""
    M, K = x.shape
    K2, N = w.shape
    assert K == K2
    tm = _fit_tile(M, _MM_TM, 8)
    tn = _fit_tile(N, _MM_TN, 128)
    tk = _fit_tile(K, _MM_TK, 128)
    Mp, Np, Kp = _round_up(M, tm), _round_up(N, tn), _round_up(K, tk)
    xp = _pad2d(x, Mp, Kp)
    wp = _pad2d(w, Kp, Np)
    out = pl.pallas_call(
        _matmul_kernel,
        out_shape=jax.ShapeDtypeStruct((Mp, Np), x.dtype),
        grid=(Mp // tm, Np // tn, Kp // tk),
        in_specs=[
            pl.BlockSpec((tm, tk), lambda i, j, k: (i, k)),
            pl.BlockSpec((tk, tn), lambda i, j, k: (k, j)),
        ],
        out_specs=pl.BlockSpec((tm, tn), lambda i, j, k: (i, j)),
        scratch_shapes=[pltpu.VMEM((tm, tn), jnp.float32)],
        compiler_params=pltpu.CompilerParams(
            dimension_semantics=("parallel", "parallel", "arbitrary"),
            vmem_limit_bytes=_VMEM_LIMIT,
        ),
    )(xp, wp)
    return out[:M, :N] if (Mp, Np) != (M, N) else out


def _rmsnorm_matmul_kernel(x_ref, nw_ref, w_ref, o_ref, xn_ref, *, eps):
    # Normalize the resident (tm, E) x block once (at j == 0), reuse across j.
    @pl.when(pl.program_id(1) == 0)
    def _():
        x = x_ref[...].astype(jnp.float32)
        r = jax.lax.rsqrt(jnp.mean(x * x, axis=-1, keepdims=True) + eps)
        xn_ref[...] = (x * r).astype(xn_ref.dtype) * nw_ref[...]

    o_ref[...] = jnp.dot(xn_ref[...], w_ref[...],
                         preferred_element_type=jnp.float32).astype(o_ref.dtype)


def pallas_rmsnorm_matmul(x, norm_w, w, eps):
    """(RMSNorm(x) * norm_w) @ w with the norm fused into the projection.

    The contraction dim E is left untiled so the full row is available for the
    norm; the normalized block is cached in VMEM and reused across N tiles.
    """
    M, E = x.shape
    E2, N = w.shape
    assert E == E2
    tm = _fit_tile(M, _MM_TM, 8)
    tn = _fit_tile(N, _RMS_MM_TN, 128)
    isz = x.dtype.itemsize

    def _fp(tm_, tn_):  # double-buffered x/w/out + xn scratch (bytes)
        return (2 * tm_ * E + tm_ * E + 2 * E * tn_ + 2 * tm_ * tn_) * isz

    while _fp(tm, tn) > _VMEM_BUDGET:
        if 3 * tm >= 2 * tn and _halve(tm, 8) < tm:
            tm = _halve(tm, 8)
        elif _halve(tn, 128) < tn:
            tn = _halve(tn, 128)
        elif _halve(tm, 8) < tm:
            tm = _halve(tm, 8)
        else:
            break

    Mp, Np = _round_up(M, tm), _round_up(N, tn)
    xp = _pad2d(x, Mp, E)
    wp = _pad2d(w, E, Np)
    nw = norm_w.reshape(1, E)
    out = pl.pallas_call(
        functools.partial(_rmsnorm_matmul_kernel, eps=eps),
        out_shape=jax.ShapeDtypeStruct((Mp, Np), x.dtype),
        grid=(Mp // tm, Np // tn),
        in_specs=[
            pl.BlockSpec((tm, E), lambda i, j: (i, 0)),
            pl.BlockSpec((1, E), lambda i, j: (0, 0)),
            pl.BlockSpec((E, tn), lambda i, j: (0, j)),
        ],
        out_specs=pl.BlockSpec((tm, tn), lambda i, j: (i, j)),
        scratch_shapes=[pltpu.VMEM((tm, E), x.dtype)],
        compiler_params=pltpu.CompilerParams(
            dimension_semantics=("parallel", "arbitrary"),
            vmem_limit_bytes=_VMEM_LIMIT,
        ),
    )(xp, nw, wp)
    return out[:M, :N] if (Mp, Np) != (M, N) else out


def _ffn_kernel(x_ref, nw_ref, wg_ref, wu_ref, wd_ref, o_ref, xn_ref, acc_ref,
                *, eps):
    k = pl.program_id(1)

    @pl.when(k == 0)
    def _():
        x = x_ref[...].astype(jnp.float32)
        r = jax.lax.rsqrt(jnp.mean(x * x, axis=-1, keepdims=True) + eps)
        xn_ref[...] = (x * r).astype(xn_ref.dtype) * nw_ref[...]
        acc_ref[...] = jnp.zeros(acc_ref.shape, jnp.float32)

    xn = xn_ref[...]
    g = jnp.dot(xn, wg_ref[...], preferred_element_type=jnp.float32)
    u = jnp.dot(xn, wu_ref[...], preferred_element_type=jnp.float32)
    h = (g * jax.nn.sigmoid(g)) * u                      # silu(gate) * up, fp32
    acc_ref[...] += jnp.dot(h.astype(xn.dtype), wd_ref[...],
                            preferred_element_type=jnp.float32)

    @pl.when(k == pl.num_programs(1) - 1)
    def _():
        o_ref[...] = acc_ref[...].astype(o_ref.dtype)


def pallas_ffn(x, norm_w, w_gate, w_up, w_down, eps):
    """Fused RMSNorm + SwiGLU MLP; hidden dim tiled and accumulated in VMEM."""
    M, E = x.shape
    Kh = w_gate.shape[1]
    tm = _fit_tile(M, _FFN_TM, 8)
    tk = _fit_tile(Kh, _FFN_TK, 128)
    isz = x.dtype.itemsize

    def _fp(tm_, tk_):  # x(x2) + xn + out(x2) + fp32 acc + wg/wu/wd (x2 each)
        return tm_ * E * (5 * isz + 4) + 6 * E * tk_ * isz

    while _fp(tm, tk) > _VMEM_BUDGET:
        if tm * (5 * isz + 4) >= 6 * tk * isz and _halve(tm, 8) < tm:
            tm = _halve(tm, 8)
        elif _halve(tk, 128) < tk:
            tk = _halve(tk, 128)
        elif _halve(tm, 8) < tm:
            tm = _halve(tm, 8)
        else:
            break

    Mp, Kp = _round_up(M, tm), _round_up(Kh, tk)
    xp = _pad2d(x, Mp, E)
    wgp = _pad2d(w_gate, E, Kp)
    wup = _pad2d(w_up, E, Kp)
    wdp = _pad2d(w_down, Kp, E)
    nw = norm_w.reshape(1, E)
    out = pl.pallas_call(
        functools.partial(_ffn_kernel, eps=eps),
        out_shape=jax.ShapeDtypeStruct((Mp, E), x.dtype),
        grid=(Mp // tm, Kp // tk),
        in_specs=[
            pl.BlockSpec((tm, E), lambda i, k: (i, 0)),
            pl.BlockSpec((1, E), lambda i, k: (0, 0)),
            pl.BlockSpec((E, tk), lambda i, k: (0, k)),
            pl.BlockSpec((E, tk), lambda i, k: (0, k)),
            pl.BlockSpec((tk, E), lambda i, k: (k, 0)),
        ],
        out_specs=pl.BlockSpec((tm, E), lambda i, k: (i, 0)),
        scratch_shapes=[pltpu.VMEM((tm, E), x.dtype),
                        pltpu.VMEM((tm, E), jnp.float32)],
        compiler_params=pltpu.CompilerParams(
            dimension_semantics=("parallel", "arbitrary"),
            vmem_limit_bytes=_VMEM_LIMIT,
        ),
    )(xp, nw, wgp, wup, wdp)
    return out[:M] if Mp != M else out


def _flash_attn_kernel(q_ref, k_ref, v_ref, o_ref, qs_ref, m_ref, l_ref, acc_ref,
                       *, scale, tq, tkv):
    qi = pl.program_id(1)
    ki = pl.program_id(2)

    @pl.when(ki == 0)
    def _():
        # 1/sqrt(D) applied once per q tile (not per KV step).
        qs_ref[...] = (q_ref[0].astype(jnp.float32) * scale).astype(qs_ref.dtype)
        m_ref[...] = jnp.full(m_ref.shape, -jnp.inf, jnp.float32)
        l_ref[...] = jnp.zeros(l_ref.shape, jnp.float32)
        acc_ref[...] = jnp.zeros(acc_ref.shape, jnp.float32)

    q_row0 = qi * tq
    k_col0 = ki * tkv
    visible = k_col0 <= q_row0 + (tq - 1)            # not entirely in the future
    full_vis = k_col0 + (tkv - 1) <= q_row0          # no causal masking needed

    def _scores():
        # Contract q[-1] with k[-1]; no materialized k.T relayout.
        return jax.lax.dot_general(qs_ref[...], k_ref[0],
                                   (((1,), (1,)), ((), ())),
                                   preferred_element_type=jnp.float32)

    def _update(s):
        m_prev = m_ref[...]
        m_new = jnp.maximum(m_prev, jnp.max(s, axis=-1, keepdims=True))
        alpha = jnp.exp(m_prev - m_new)
        p = jnp.exp(s - m_new)
        l_ref[...] = alpha * l_ref[...] + jnp.sum(p, axis=-1, keepdims=True)
        acc_ref[...] = alpha * acc_ref[...] + jnp.dot(
            p.astype(v_ref.dtype), v_ref[0], preferred_element_type=jnp.float32)
        m_ref[...] = m_new

    @pl.when(full_vis)
    def _():                                          # fully visible: no mask work
        _update(_scores())

    @pl.when(visible & jnp.logical_not(full_vis))
    def _():                                          # diagonal tile: masked
        s = _scores()
        row = q_row0 + jax.lax.broadcasted_iota(jnp.int32, (tq, tkv), 0)
        col = k_col0 + jax.lax.broadcasted_iota(jnp.int32, (tq, tkv), 1)
        _update(jnp.where(row >= col, s, -1e30))

    @pl.when(ki == pl.num_programs(2) - 1)
    def _():
        # Exact fp32 divide for parity with the PyTorch reference softmax.
        o_ref[0] = (acc_ref[...] / l_ref[...]).astype(o_ref.dtype)


def pallas_gqa_attention(q_BHTD, k_BJTD, v_BJTD):
    """Flash-style causal GQA attention; KV head sharing via the index_map."""
    B, H, T, D = q_BHTD.shape
    J = k_BJTD.shape[1]
    rep = H // J
    scale = 1.0 / math.sqrt(D)

    if T <= _ATTN_TQ:
        tq = tkv = T
        Tp = T
    else:
        tq, tkv = _ATTN_TQ, _ATTN_TKV
        Tp = _round_up(T, max(tq, tkv))

    qf = q_BHTD.reshape(B * H, T, D)
    kf = k_BJTD.reshape(B * J, T, D)
    vf = v_BJTD.reshape(B * J, T, D)
    if Tp != T:
        pad = ((0, 0), (0, Tp - T), (0, 0))
        qf, kf, vf = jnp.pad(qf, pad), jnp.pad(kf, pad), jnp.pad(vf, pad)

    def q_map(bh, qi, ki):
        return (bh, qi, 0)

    def kv_map(bh, qi, ki):
        # bh = b*H + h  ->  shared KV head b*J + h // rep.  Clamp the KV tile
        # to the last causally-needed one so fully-future tiles repeat the
        # previous block index: Pallas then skips both their DMA and refetch.
        kmax = ((qi + 1) * tq - 1) // tkv
        return ((bh // H) * J + (bh % H) // rep, jnp.minimum(ki, kmax), 0)

    out = pl.pallas_call(
        functools.partial(_flash_attn_kernel, scale=scale, tq=tq, tkv=tkv),
        out_shape=jax.ShapeDtypeStruct((B * H, Tp, D), q_BHTD.dtype),
        grid=(B * H, Tp // tq, Tp // tkv),
        in_specs=[
            pl.BlockSpec((1, tq, D), q_map),
            pl.BlockSpec((1, tkv, D), kv_map),
            pl.BlockSpec((1, tkv, D), kv_map),
        ],
        out_specs=pl.BlockSpec((1, tq, D), q_map),
        scratch_shapes=[
            pltpu.VMEM((tq, D), q_BHTD.dtype),   # q scaled by 1/sqrt(D)
            pltpu.VMEM((tq, 1), jnp.float32),    # running max m
            pltpu.VMEM((tq, 1), jnp.float32),    # running denom l
            pltpu.VMEM((tq, D), jnp.float32),    # output accumulator
        ],
        compiler_params=pltpu.CompilerParams(
            dimension_semantics=("parallel", "parallel", "arbitrary"),
            vmem_limit_bytes=_VMEM_LIMIT,
        ),
    )(qf, kf, vf)
    if Tp != T:
        out = out[:, :T]
    return out.reshape(B, H, T, D)


# -------------------------------- JAX glue ------------------------------------


def precompute_freq_cis(dim, rope_base, max_seq_len):
    assert dim % 2 == 0
    theta_F = 1.0 / rope_base ** (jnp.arange(0, dim, 2, dtype=jnp.float32) / dim)
    pos_T = jnp.arange(max_seq_len, dtype=jnp.float32)
    freq_TF = pos_T[:, None] * theta_F[None, :]
    return jnp.stack([jnp.cos(freq_TF), jnp.sin(freq_TF)], axis=-1)  # (T, F, 2)


def apply_rotary_embd(x_BXTD, freq_cis_TFC):
    # TODO(synk): interleaved-pair rotary + head split/merge transposes kept as
    # XLA glue; fusing them into the QKV/attention kernels needs an in-kernel
    # even/odd lane swizzle and head-granular (D < 128) block tiling.
    B, X, T, D = x_BXTD.shape
    xr = x_BXTD.reshape(B, X, T, D // 2, 2)
    cos = freq_cis_TFC[..., 0]  # (T, F), fp32
    sin = freq_cis_TFC[..., 1]  # (T, F), fp32
    x0, x1 = xr[..., 0], xr[..., 1]
    out = jnp.stack([x0 * cos - x1 * sin, x1 * cos + x0 * sin], axis=-1)
    return out.reshape(B, X, T, D).astype(x_BXTD.dtype)


def init_params(key, cfg, dtype=jnp.bfloat16):
    V, E = cfg["vocab_size"], cfg["d_embd"]
    H, J = cfg["n_heads"], cfg["n_kv_heads"]
    Kh = cfg["d_hid"]
    d_head = E // H
    d_kv = J * d_head
    keys = jax.random.split(key, 2 + 6 * cfg["n_layers"])
    scale = 0.02

    params = {
        "tok_embd": (scale * jax.random.normal(keys[0], (V, E))).astype(dtype),
        "lm_head": (scale * jax.random.normal(keys[1], (E, V))).astype(dtype),
        "final_norm": jnp.ones((E,), dtype),
        "blocks": [],
    }
    for l in range(cfg["n_layers"]):
        k = keys[2 + 6 * l: 2 + 6 * (l + 1)]
        params["blocks"].append({
            "attn_norm": jnp.ones((E,), dtype),
            "attn_proj": (scale * jax.random.normal(k[0], (E, E + 2 * d_kv))).astype(dtype),
            "out_proj": (scale * jax.random.normal(k[1], (E, E))).astype(dtype),
            "ffn_norm": jnp.ones((E,), dtype),
            "gate_proj": (scale * jax.random.normal(k[2], (E, Kh))).astype(dtype),
            "up_proj": (scale * jax.random.normal(k[3], (E, Kh))).astype(dtype),
            "down_proj": (scale * jax.random.normal(k[4], (Kh, E))).astype(dtype),
        })
    return params


def llama_block(x_BTE, blk, freq_cis_TFC, cfg):
    B, T, E = x_BTE.shape
    H, J = cfg["n_heads"], cfg["n_kv_heads"]
    d_head = E // H
    d_kv = J * d_head
    eps = cfg["norm_eps"]

    x2d = x_BTE.reshape(B * T, E)

    # --- attention sub-block (attn_norm fused into the QKV projection) ---
    qkv = pallas_rmsnorm_matmul(x2d, blk["attn_norm"], blk["attn_proj"], eps)
    qkv = qkv.reshape(B, T, E + 2 * d_kv)
    q = qkv[..., :E]
    k = qkv[..., E:E + d_kv]
    v = qkv[..., E + d_kv:]
    split_heads = lambda z, n: z.reshape(B, T, n, d_head).transpose(0, 2, 1, 3)
    q_BHTD = apply_rotary_embd(split_heads(q, H), freq_cis_TFC)
    k_BJTD = apply_rotary_embd(split_heads(k, J), freq_cis_TFC)
    v_BJTD = split_heads(v, J)
    # GQA: no jnp.repeat — KV head sharing is resolved in the attention index_map.
    o_BHTD = pallas_gqa_attention(q_BHTD, k_BJTD, v_BJTD)
    o_2d = o_BHTD.transpose(0, 2, 1, 3).reshape(B * T, E)
    # TODO(synk): residual adds left as XLA glue (could be fused into the
    # out_proj / FFN epilogues to save one HBM pass each).
    h2d = x2d + pallas_matmul(o_2d, blk["out_proj"])

    # --- ffn sub-block (ffn_norm fused into the SwiGLU kernel) ---
    out2d = h2d + pallas_ffn(h2d, blk["ffn_norm"], blk["gate_proj"],
                             blk["up_proj"], blk["down_proj"], eps)
    return out2d.reshape(B, T, E)


def llama_forward(params, idx_BT, freq_cis_TFC, cfg):
    B, T = idx_BT.shape
    E = cfg["d_embd"]
    # TODO(synk): token-embedding gather has no clean rectangular BlockSpec; kept as glue.
    x_BTE = jnp.take(params["tok_embd"], idx_BT, axis=0)
    for blk in params["blocks"]:
        x_BTE = llama_block(x_BTE, blk, freq_cis_TFC, cfg)
    x2d = x_BTE.reshape(B * T, E)
    # Final RMSNorm fused into the lm_head projection (vocab axis tiled).
    logits = pallas_rmsnorm_matmul(x2d, params["final_norm"], params["lm_head"],
                                   cfg["norm_eps"])
    return logits.reshape(B, T, cfg["vocab_size"])


# ---------------------------------- main --------------------------------------

if __name__ == "__main__":
    cfg = dict(
        vocab_size=64,
        d_embd=32,
        n_layers=2,
        n_heads=4,
        n_kv_heads=2,
        d_hid=64,
        norm_eps=1e-5,
        rope_base=10000.0,
        max_seq_len=8,
    )
    B, T = 2, cfg["max_seq_len"]

    key = jax.random.PRNGKey(0)
    k_params, k_idx = jax.random.split(key)
    params = init_params(k_params, cfg, dtype=jnp.bfloat16)
    freq_cis_TFC = precompute_freq_cis(
        cfg["d_embd"] // cfg["n_heads"], cfg["rope_base"], cfg["max_seq_len"]
    )
    idx_BT = jax.random.randint(k_idx, (B, T), 0, cfg["vocab_size"], dtype=jnp.int32)

    logits_BTV = llama_forward(params, idx_BT, freq_cis_TFC, cfg)
    jax.block_until_ready(logits_BTV)
    assert logits_BTV.shape == (B, T, cfg["vocab_size"])
    assert bool(jnp.all(jnp.isfinite(logits_BTV.astype(jnp.float32))))
    print("KERNEL_OK")
</pallas_src>

<mosaic_0001>
module attributes {stable_mosaic.version = 11 : i64} {
  func.func @_rmsnorm_matmul_kernel(%arg0: i32, %arg1: i32, %arg2: memref<16x32xbf16, #tpu.memory_space<vmem>>, %arg3: memref<1x32xbf16, #tpu.memory_space<vmem>>, %arg4: memref<32x64xbf16, #tpu.memory_space<vmem>>, %arg5: memref<16x64xbf16, #tpu.memory_space<vmem>>, %arg6: memref<16x32xbf16, #tpu.memory_space<vmem>>) attributes {dimension_semantics = [#tpu.dimension_semantics<parallel>, #tpu.dimension_semantics<arbitrary>], iteration_bounds = array<i64: 1, 1>, scalar_prefetch = 0 : i64, scratch_operands = 1 : i64, tpu.core_type = #tpu.core_type<tc>, window_params = [{transform_indices = @transform_0, window_bounds = array<i64: 16, 32>}, {pipeline_mode = #tpu.pipeline_mode<synchronous>, transform_indices = @transform_1, window_bounds = array<i64: 1, 32>}, {transform_indices = @transform_2, window_bounds = array<i64: 32, 64>}, {transform_indices = @transform_3, window_bounds = array<i64: 16, 64>}]} {
    %c0_i32 = arith.constant 0 : i32
    %0 = arith.cmpi eq, %arg1, %c0_i32 : i32
    %1 = arith.extui %0 : i1 to i32
    %c0_i32_0 = arith.constant 0 : i32
    %2 = arith.cmpi ne, %1, %c0_i32_0 : i32
    scf.if %2 {
      %c0_6 = arith.constant 0 : index
      %c0_7 = arith.constant 0 : index
      %8 = vector.load %arg2[%c0_6, %c0_7] : memref<16x32xbf16, #tpu.memory_space<vmem>>, vector<16x32xbf16>
      %9 = arith.extf %8 : vector<16x32xbf16> to vector<16x32xf32>
      %10 = arith.mulf %9, %9 : vector<16x32xf32>
      %cst_8 = arith.constant dense<0.000000e+00> : vector<16xf32>
      %11 = vector.multi_reduction <add>, %10, %cst_8 [1] : vector<16x32xf32> to vector<16xf32>
      %12 = vector.shape_cast %11 : vector<16xf32> to vector<16x1xf32>
      %cst_9 = arith.constant 3.200000e+01 : f32
      %13 = vector.broadcast %cst_9 : f32 to vector<16x1xf32>
      %14 = arith.divf %12, %13 : vector<16x1xf32>
      %cst_10 = arith.constant 9.99999974E-6 : f32
      %15 = vector.broadcast %cst_10 : f32 to vector<16x1xf32>
      %16 = arith.addf %14, %15 : vector<16x1xf32>
      %17 = math.rsqrt %16 : vector<16x1xf32>
      %18 = vector.broadcast %17 : vector<16x1xf32> to vector<16x32xf32>
      %19 = arith.mulf %9, %18 : vector<16x32xf32>
      %20 = arith.truncf %19 : vector<16x32xf32> to vector<16x32xbf16>
      %c0_11 = arith.constant 0 : index
      %c0_12 = arith.constant 0 : index
      %21 = vector.load %arg3[%c0_11, %c0_12] : memref<1x32xbf16, #tpu.memory_space<vmem>>, vector<1x32xbf16>
      %22 = vector.broadcast %21 : vector<1x32xbf16> to vector<16x32xbf16>
      %23 = arith.mulf %20, %22 : vector<16x32xbf16>
      %c0_13 = arith.constant 0 : index
      %c0_14 = arith.constant 0 : index
      %24 = vector.load %arg6[%c0_13, %c0_14] : memref<16x32xbf16, #tpu.memory_space<vmem>>, vector<16x32xbf16>
      tpu.vector_store %arg6[%c0_13, %c0_14], %23 {strides = array<i32>} : memref<16x32xbf16, #tpu.memory_space<vmem>>, vector<16x32xbf16>,
    } else {
    }
    %c0 = arith.constant 0 : index
    %c0_1 = arith.constant 0 : index
    %3 = vector.load %arg6[%c0, %c0_1] : memref<16x32xbf16, #tpu.memory_space<vmem>>, vector<16x32xbf16>
    %c0_2 = arith.constant 0 : index
    %c0_3 = arith.constant 0 : index
    %4 = vector.load %arg4[%c0_2, %c0_3] : memref<32x64xbf16, #tpu.memory_space<vmem>>, vector<32x64xbf16>
    %cst = arith.constant dense<0.000000e+00> : vector<16x64xf32>
    %5 = tpu.matmul %3, %4, %cst {dimension_numbers = #tpu.dot_dimension_numbers<[1], [0], [0], [1], [0, 0, 1, 1], [], []>} : vector<16x32xbf16>, vector<32x64xbf16>, vector<16x64xf32> -> vector<16x64xf32>
    %6 = arith.truncf %5 : vector<16x64xf32> to vector<16x64xbf16>
    %c0_4 = arith.constant 0 : index
    %c0_5 = arith.constant 0 : index
    %7 = vector.load %arg5[%c0_4, %c0_5] : memref<16x64xbf16, #tpu.memory_space<vmem>>, vector<16x64xbf16>
    tpu.vector_store %arg5[%c0_4, %c0_5], %6 {strides = array<i32>} : memref<16x64xbf16, #tpu.memory_space<vmem>>, vector<16x64xbf16>,
    return
  }
  func.func @transform_0(%arg0: i32, %arg1: i32) -> (i32, i32) {
    %c0_i32 = arith.constant 0 : i32
    %c0_i32_0 = arith.constant 0 : i32
    return %arg0, %c0_i32 : i32, i32
  }
  func.func @transform_1(%arg0: i32, %arg1: i32) -> (i32, i32) {
    %c0_i32 = arith.constant 0 : i32
    %c0_i32_0 = arith.constant 0 : i32
    %c0_i32_1 = arith.constant 0 : i32
    return %c0_i32, %c0_i32_0 : i32, i32
  }
  func.func @transform_2(%arg0: i32, %arg1: i32) -> (i32, i32) {
    %c0_i32 = arith.constant 0 : i32
    %c0_i32_0 = arith.constant 0 : i32
    return %c0_i32, %arg1 : i32, i32
  }
  func.func @transform_3(%arg0: i32, %arg1: i32) -> (i32, i32) {
    %c0_i32 = arith.constant 0 : i32
    return %arg0, %arg1 : i32, i32
  }
}

</mosaic_0001>

<bundles_post_ra>
// kernel: tpu_custom_call.1
= control target key start
LH: loop header
LB: loop body
LE: loop exit
PB: predicated region body
PF: predicated region fallthrough
CT: control target
= control target key end

     0   :  { %8 = vsyncpa [#allocation4], 0  ;;  %s343_s0 = inlined_call_operand.hbm [shape: bf16[16,32], index: 0, kind: input, shape index: {}]   ;;  %s344_s1 = inlined_call_operand.vmem [shape: bf16[1,32], index: 1, kind: input, shape index: {}]   ;;  %s345_s2 = inlined_call_operand.hbm [shape: bf16[32,64], index: 2, kind: input, shape index: {}]   ;;  %s346_s3 = inlined_call_operand.hbm [shape: bf16[16,64], index: 3, kind: output, shape index: {}]  }
   0x1   :  { %9 = vsyncpa [#allocation7], 0 }
   0x2   :  { %10 = vsyncpa [#allocation5], 0  ;;  %s292_s12 = smov [#allocation3]  }
   0x3   :  { %s16_s13 = sshll.u32 %s292_s12, 4  ;;  %s17_s13 = int_to_ptr.vmem [resolvable:$true] %s16_s13 }
   0x4   :  { %s234_s14 = scalar_lea.vmem %s17_s13, 128  ;;  %p239_p1 = scmp.lt.s32.totalorder %s17_s13, %s17_s13 }
   0x5   :  { %p235_p0 = scmp.ne.s32.totalorder %s17_s13, %s234_s14  ;;  %p240_p2 = scmp.lt.s32.totalorder %s234_s14, %s234_s14 }
   0x7   :  { %p241_p3 = por %p240_p2, %p239_p1 }
   0x9   :  { %p242_p4 = pnand %p241_p3, %p235_p0 }
   0xb   :  { %245 = shalt.err (!%p242_p4)
}
   0xc   :  { %s293_s15 = smov 64   ;;  %s294_s16 = smov 4  }
   0xd   :  { %22 = dma.hbm_to_vmem [thread:$0]  %s343_s0, 128, %s17_s13, [#allocation4], %s293_s15, %s293_s15, %s294_s16  }
   0xe   :  { %s295_s19 = smov [#allocation6]  }
   0xf   :  { %s30_s20 = sshll.u32 %s295_s19, 4  ;;  %s31_s20 = int_to_ptr.vmem [resolvable:$true] %s30_s20 }
  0x10   :  { %s254_s21 = scalar_lea.vmem %s31_s20, 256  ;;  %p259_p6 = scmp.lt.s32.totalorder %s31_s20, %s31_s20 }
  0x11   :  { %p255_p5 = scmp.ne.s32.totalorder %s31_s20, %s254_s21  ;;  %p260_p7 = scmp.lt.s32.totalorder %s254_s21, %s254_s21 }
  0x13   :  { %p261_p8 = por %p260_p7, %p259_p6 }
  0x15   :  { %p262_p9 = pnand %p261_p8, %p255_p5 }
  0x17   :  { %265 = shalt.err (!%p262_p9)
}
  0x18   :  { %36 = dma.hbm_to_vmem [thread:$0]  %s345_s2, 256, %s31_s20, [#allocation7], %s293_s15, %s293_s15, %s294_s16  }
  0x19   :  { %286 = dma.done.wait [#allocation4], 128  }
  0x1a   :  { %287 = vsyncadd [#allocation4], 4294967168 }
  0x1b   :  { %288 = dma.done.wait [#allocation7], 256  }
  0x1c   :  { %289 = vsyncadd [#allocation7], 4294967040  ;;  %v198_v0 = vld [vmem:[#allocation3] sm:$0xff]   ;;  %vm54_vm0 = vcmask 261120   ;;  %v219_v7 = vld [vmem:[#allocation6 + $0x8] sm:$0xff]   ;;  %v296_v8 = vmov 0.0   ;;  %v75_v16 = vlaneseq }
  0x1d   :  { %v199_v1 = vunpack.c.l.bf16 %v198_v0  ;;  %v200_v2 = vunpack.c.h.bf16 %v198_v0  ;;  %204 = vmatprep.subr.bf16.mxu0 %v296_v8  ;;  %vm297_vm1 = vmmov 0   ;;  %v220_v9 = vld [vmem:[#allocation6] sm:$0xff]   ;;  %v71_v18 = vld [vmem:[%s344_s1] sm:$0x1]  ;;  %vm87_vm2 = vcmask 257024   ;;  %s298_s1 = smov [#allocation8]  }
  0x1e   :  { %208 = vmatprep.mubr.msk.bf16.mxu0 %vm297_vm1, %v296_v8  ;;  %205 = vmatpush3.bf16.msra.mxu0 %v219_v7  ;;  %v76_v17 = vshrl.u32 %v75_v16, 7  ;;  %v73_v19 = vpack.i.b16 %v71_v18, %v71_v18  ;;  %vm166_vm3 = vcmask 519168   ;;  %s174_s24 = sshll.u32 %s298_s1, 4  ;;  %s175_s24 = int_to_ptr.vmem [resolvable:$true] %s174_s24 }
  0x1f   :  { %v52_v3 = vmul.f32 %v199_v1, %v199_v1  ;;  %v53_v4 = vmul.f32 %v200_v2, %v200_v2  ;;  %206 = vmatprep.subr.bf16.mxu0 %v296_v8  ;;  %s266_s25 = scalar_lea.vmem %s175_s24, 128  ;;  %p271_p11 = scmp.lt.s32.totalorder %s175_s24, %s175_s24 }
  0x20   :  { %v77_v20 = vsub.s32 0, %v76_v17  ;;  %p267_p10 = scmp.ne.s32.totalorder %s175_s24, %s266_s25  ;;  %p272_p12 = scmp.lt.s32.totalorder %s266_s25, %s266_s25 }
  0x21   :  { %v55_v5 = vsel %vm54_vm0, %v52_v3, 0.0  ;;  %v58_v6 = vsel %vm54_vm0, %v53_v4, 0.0 }
  0x22   :  { %56 = vadd.xlane.f32.xlu0 %v55_v5  ;;  %207 = vmatpush3.bf16.msra.mxu0 %v220_v9  ;;  %v78_v24 = vrot.slane %v73_v19, %v77_v20  ;;  %p273_p13 = por %p272_p12, %p271_p11 }
  0x24   :  { %p274_p0 = pnand %p273_p13, %p267_p10 }
  0x26   :  { %59 = vadd.xlane.f32.xlu0 %v58_v6 }
  0xab   :  { %v57_v10 = vpop.xlane.xlu0 %56 }
  0xac   :  { %v62_v11 = vmul.f32 0.03125, %v57_v10 }
  0xae   :  { %v64_v12 = vadd.f32 1e-05, %v62_v11 }
  0xaf   :  { %v60_v13 = vpop.xlane.xlu0 %59 }
  0xb0   :  { %v63_v14 = vmul.f32 0.03125, %v60_v13  ;;  %222 = vrsqrt.f32 %v64_v12 }
  0xb2   :  { %v65_v15 = vadd.f32 1e-05, %v63_v14 }
  0xb4   :  { %224 = vrsqrt.f32 %v65_v15 }
  0xbd   :  { %v223_v21 = vpop.eup %222 }
  0xbe   :  { %v68_v23 = vmul.f32 %v223_v21, %v199_v1 }
  0xc1   :  { %v225_v22 = vpop.eup %224 }
  0xc2   :  { %v69_v25 = vmul.f32 %v225_v22, %v200_v2 }
  0xc4   :  { %v70_v26 = vpack.c.bf16 %v69_v25, %v68_v23 }
  0xc6   :  { %v79_v27 = vmul.bf16 %v78_v24, %v70_v26 }
  0xc8   :  { %v187_v28 = vcombine.low %v79_v27, %v79_v27  ;;  %v188_v29 = vcombine.high %v79_v27, %v79_v27 }
  0xca   :  { %88 = vst.msk [vmem:[#allocation2] sm:$0xf] %vm87_vm2, %v187_v28  ;;  %89 = vst.msk [vmem:[#allocation2 + $0x4] sm:$0xf] %vm87_vm2, %v188_v29 }
  0xd1   :  { %v221_v30 = vld [vmem:[#allocation2] sm:$0xff]  }
  0xd2   :  { %209 = vmatmul.mubr.msk.bf16.vlgmr.msra.gmra.mxu0 %vm54_vm0, %v221_v30 }
 0x192   :  { %v151_v31 = vpop.f32.mrf.mxu0 }
 0x193   :  { %v195_v32 = vpack.c.bf16 %v151_v31, %v151_v31 }
 0x194   :  { %v210_v33 = vpop.f32.mrf.mxu0 }
 0x195   :  { %167 = vst.msk [vmem:[#allocation8] sm:$0xf] %vm166_vm3, %v195_v32 }
 0x196   :  { %v154_v34 = vpop.f32.mrf.mxu0 }
 0x197   :  { %v196_v35 = vpack.c.bf16 %v154_v34, %v154_v34 }
 0x198   :  { %v211_v36 = vpop.f32.mrf.mxu0 }
 0x199   :  { %168 = vst.msk [vmem:[#allocation8 + $0x4] sm:$0xf] %vm166_vm3, %v196_v35 }
 0x19a   :  { %277 = shalt.err (!%p274_p0)
}
 0x19b   :  { %180 = dma.vmem_to_hbm [thread:$0]  %s175_s24, 128, %s346_s3, [#allocation5], %s293_s15, %s293_s15, %s294_s16  }
 0x19c   :  { %290 = dma.done.wait [#allocation5], 128  }
 0x19d   :  { %291 = vsyncadd [#allocation5], 4294967168 }
 0x19e   :  { %184 = vsyncpa [#allocation4], 1 }
 0x19f   :  { %185 = vsyncpa [#allocation7], 1 }
 0x1a0   :  { %186 = vsyncpa [#allocation5], 1 }

</bundles_post_ra>
